<compile_context>
chip_gen: v7x
topology: tpu7x:2x2x1
jax: 0.10.0
libtpu: 0.0.40
codegen_flags: <defaults>
</compile_context>

<pallas_src>
import functools

import jax
import jax.numpy as jnp
from jax import lax
from jax.experimental import pallas as pl
from jax.experimental.pallas import tpu as pltpu


def _glore_kernel(x_ref,
                  wpt_ref, bpt_ref,
                  wadj_ref, badj_ref,
                  wwg_ref, bwg_ref,
                  w3_ref, b3_ref,
                  out_ref, *, c2):
    nb = x_ref.shape[0]                 # batch samples handled per grid step (static)
    for n in range(nb):                 # small static unroll
        xm = x_ref[n]                                    # (C, HW) f32
        xb = xm.astype(jnp.bfloat16)

        # Fused phi/theta 1x1 convs (BN scales pre-folded into the stacked
        # weight): a single MXU pass over the (C, HW) operand, then bias+ReLU.
        pt = jnp.dot(wpt_ref[...], xb, preferred_element_type=jnp.float32)
        pt = jnp.maximum(pt + bpt_ref[...], 0.0)         # (C2+Cr, HW)
        phi = pt[:c2].astype(jnp.bfloat16)               # (C2, HW)
        th = pt[c2:].astype(jnp.bfloat16)                # (Cr, HW)

        # z_idt = phi @ theta^T  (contract over HW, no explicit transpose).
        z_idt = lax.dot_general(phi, th, (((1,), (1,)), ((), ())),
                                preferred_element_type=jnp.float32)  # (C2, Cr)

        # conv_adj + bn_adj + relu applied to z_idt^T, transposed back:
        # (Wadj @ z^T)^T == z @ Wadj^T ; bn_adj scale folded into Wadj rows.
        z1t = lax.dot_general(z_idt, wadj_ref[...], (((1,), (1,)), ((), ())),
                              preferred_element_type=jnp.float32)    # (C2, Cr)
        z1t = jnp.maximum(z1t + badj_ref[...], 0.0)
        z = z1t + z_idt

        # conv_wg + bn_wg + relu (scale folded into weight).
        z = jnp.dot(wwg_ref[...], z, preferred_element_type=jnp.float32)
        z = jnp.maximum(z + bwg_ref[...], 0.0)           # (C2, Cr)

        # Reassociated output path: (w3' @ z) @ theta  (exactly associative),
        # so the big HW-sized matmul contracts only Cr instead of C2 channels.
        w3z = jnp.dot(w3_ref[...], z, preferred_element_type=jnp.float32)  # (C, Cr)
        y = jnp.dot(w3z.astype(jnp.bfloat16), th,
                    preferred_element_type=jnp.float32)                    # (C, HW)
        y = jnp.maximum(y + b3_ref[...], 0.0)

        # Residual (kept in f32).
        out_ref[n] = (xm + y).astype(out_ref.dtype)


def _fold_kernel_params(params):
    """Fold BN scales into conv weights; stack phi/theta; cast MXU weights to bf16."""
    (wphi, sphi, bphi, wth, sth, bth, wadj, sadj, badj,
     wwg, swg, bwg, w3, s3, b3) = params
    wphi_f = wphi * sphi                      # sphi: (C2, 1) column scale
    wth_f = wth * sth                         # sth:  (Cr, 1)
    wadj_f = wadj * sadj.reshape(-1, 1)       # bn_adj scales output rows of Wadj
    wwg_f = wwg * swg
    w3_f = w3 * s3
    wpt = jnp.concatenate([wphi_f, wth_f], axis=0).astype(jnp.bfloat16)  # (C2+Cr, C)
    bpt = jnp.concatenate([bphi, bth], axis=0)                           # (C2+Cr, 1)
    return (wpt, bpt, wadj_f, badj, wwg_f, bwg, w3_f, b3)


def glore_forward(x, params, *, max_batch_block=8):
    """x: (N, C, H, W) float32; params: raw folded-BN module parameters."""
    N, C, H, W = x.shape
    HW = H * W
    x_mat = x.reshape(N, C, HW)

    kparams = _fold_kernel_params(params)
    wpt = kparams[0]
    P = wpt.shape[0]
    c2 = params[0].shape[0]                  # C2 from wphi
    cr = P - c2

    # Several batch samples per grid step to amortize per-step pipeline overhead.
    nb = min(N, max_batch_block)
    while N % nb:
        nb -= 1
    grid = (N // nb,)

    def full_spec(p):
        nd = p.ndim
        return pl.BlockSpec(p.shape, lambda i, _nd=nd: (0,) * _nd)

    in_specs = [pl.BlockSpec((nb, C, HW), lambda i: (i, 0, 0))]
    in_specs += [full_spec(p) for p in kparams]

    # Explicit VMEM budget (double-buffered in/out blocks + params + intermediates)
    # and an advisory cost estimate for XLA scheduling.
    param_bytes = sum(int(p.size) * p.dtype.itemsize for p in kparams)
    block_bytes = nb * C * HW * 4
    inter_bytes = nb * HW * (6 * P + 10 * C)
    vmem_need = 4 * block_bytes + param_bytes + inter_bytes
    vmem_limit = int(min(max(2 * vmem_need, 16 * 1024 * 1024), 56 * 1024 * 1024))

    flops = 2 * N * (HW * (P * C + c2 * cr + C * cr)
                     + c2 * cr * cr + c2 * c2 * cr + C * c2 * cr)
    bytes_accessed = 2 * N * C * HW * 4 + param_bytes

    out = pl.pallas_call(
        functools.partial(_glore_kernel, c2=c2),
        out_shape=jax.ShapeDtypeStruct((N, C, HW), x.dtype),
        grid_spec=pltpu.PrefetchScalarGridSpec(
            num_scalar_prefetch=0,
            grid=grid,
            in_specs=in_specs,
            out_specs=pl.BlockSpec((nb, C, HW), lambda i: (i, 0, 0)),
        ),
        compiler_params=pltpu.CompilerParams(
            dimension_semantics=("parallel",),
            vmem_limit_bytes=vmem_limit),
        cost_estimate=pl.CostEstimate(
            flops=flops, transcendentals=0, bytes_accessed=bytes_accessed),
    )(x_mat, *kparams)
    return out.reshape(N, C, H, W)


def _fold_bn(key, c, eps=1e-5):
    """Deterministic BN params folded to (scale, bias) in inference mode."""
    k1, k2, k3, k4 = jax.random.split(key, 4)
    gamma = 1.0 + 0.1 * jax.random.normal(k1, (c,), jnp.float32)
    beta = 0.1 * jax.random.normal(k2, (c,), jnp.float32)
    mean = 0.1 * jax.random.normal(k3, (c,), jnp.float32)
    var = 1.0 + 0.1 * jax.random.uniform(k4, (c,), jnp.float32)
    scale = gamma / jnp.sqrt(var + eps)
    bias = beta - mean * scale
    return scale, bias


def make_params(key, planes, ratio=4):
    cr = planes // ratio
    c2 = cr * 2
    keys = jax.random.split(key, 10)

    wphi = 0.1 * jax.random.normal(keys[0], (c2, planes), jnp.float32)
    wth = 0.1 * jax.random.normal(keys[1], (cr, planes), jnp.float32)
    wadj = 0.1 * jax.random.normal(keys[2], (cr, cr), jnp.float32)
    wwg = 0.1 * jax.random.normal(keys[3], (c2, c2), jnp.float32)
    w3 = 0.1 * jax.random.normal(keys[4], (planes, c2), jnp.float32)

    sphi, bphi = _fold_bn(keys[5], c2)
    sth, bth = _fold_bn(keys[6], cr)
    sadj, badj = _fold_bn(keys[7], cr)
    swg, bwg = _fold_bn(keys[8], c2)
    s3, b3 = _fold_bn(keys[9], planes)
    # TODO(synk): bn_out is declared in the PyTorch module but never used in forward.
    # TODO(synk): BatchNorm implemented in inference mode (folded affine), not
    # training-mode batch statistics.

    return (wphi, sphi.reshape(c2, 1), bphi.reshape(c2, 1),
            wth, sth.reshape(cr, 1), bth.reshape(cr, 1),
            wadj, sadj.reshape(1, cr), badj.reshape(1, cr),
            wwg, swg.reshape(c2, 1), bwg.reshape(c2, 1),
            w3, s3.reshape(planes, 1), b3.reshape(planes, 1))


def glore_ref(x, params):
    """Pure-JAX f32 reference mirroring the PyTorch forward (un-fused math order)."""
    (wphi, sphi, bphi, wth, sth, bth, wadj, sadj, badj,
     wwg, swg, bwg, w3, s3, b3) = params
    N, C, H, W = x.shape
    HW = H * W
    xm = x.reshape(N, C, HW)
    relu = lambda v: jnp.maximum(v, 0.0)

    phi = relu(jnp.einsum('oc,ncs->nos', wphi, xm) * sphi[None] + bphi[None])
    th = relu(jnp.einsum('oc,ncs->nos', wth, xm) * sth[None] + bth[None])
    z_idt = jnp.einsum('ncs,nks->nck', phi, th)                 # (N, C2, Cr)
    z1t = relu(jnp.einsum('nck,ok->nco', z_idt, wadj) * sadj[None] + badj[None])
    z = z1t + z_idt
    z = relu(jnp.einsum('oc,ncr->nor', wwg, z) * swg[None] + bwg[None])
    y = jnp.einsum('ncr,nrs->ncs', z, th)
    y = relu(jnp.einsum('oc,ncs->nos', w3, y) * s3[None] + b3[None])
    return (xm + y).reshape(N, C, H, W)


if __name__ == "__main__":
    planes, ratio = 16, 4
    N, H, W = 2, 16, 16

    key = jax.random.PRNGKey(0)
    kx, kp = jax.random.split(key)
    x = jax.random.normal(kx, (N, planes, H, W), jnp.float32)
    params = make_params(kp, planes, ratio)

    out = jax.block_until_ready(glore_forward(x, params))
    ref = glore_ref(x, params)

    assert out.shape == x.shape
    # bf16 MXU operands + the reassociated (w3@z)@theta path change rounding
    # slightly vs the pure-f32 reference; tolerance loosened accordingly.
    assert jnp.allclose(out, ref, atol=5e-2, rtol=5e-2), (
        f"max abs diff {jnp.max(jnp.abs(out - ref))}")

    print("KERNEL_OK")
</pallas_src>

<mosaic_0001>
module attributes {stable_mosaic.version = 11 : i64} {
  func.func @_glore_kernel(%arg0: i32, %arg1: memref<2x16x256xf32, #tpu.memory_space<vmem>>, %arg2: memref<12x16xbf16, #tpu.memory_space<vmem>>, %arg3: memref<12x1xf32, #tpu.memory_space<vmem>>, %arg4: memref<4x4xf32, #tpu.memory_space<vmem>>, %arg5: memref<1x4xf32, #tpu.memory_space<vmem>>, %arg6: memref<8x8xf32, #tpu.memory_space<vmem>>, %arg7: memref<8x1xf32, #tpu.memory_space<vmem>>, %arg8: memref<16x8xf32, #tpu.memory_space<vmem>>, %arg9: memref<16x1xf32, #tpu.memory_space<vmem>>, %arg10: memref<2x16x256xf32, #tpu.memory_space<vmem>>) attributes {dimension_semantics = [#tpu.dimension_semantics<parallel>], iteration_bounds = array<i64: 1>, scalar_prefetch = 0 : i64, scratch_operands = 0 : i64, tpu.core_type = #tpu.core_type<tc>, window_params = [{transform_indices = @transform_0, window_bounds = array<i64: 2, 16, 256>}, {pipeline_mode = #tpu.pipeline_mode<synchronous>, transform_indices = @transform_1, window_bounds = array<i64: 12, 16>}, {pipeline_mode = #tpu.pipeline_mode<synchronous>, transform_indices = @transform_2, window_bounds = array<i64: 12, 1>}, {pipeline_mode = #tpu.pipeline_mode<synchronous>, transform_indices = @transform_3, window_bounds = array<i64: 4, 4>}, {pipeline_mode = #tpu.pipeline_mode<synchronous>, transform_indices = @transform_4, window_bounds = array<i64: 1, 4>}, {pipeline_mode = #tpu.pipeline_mode<synchronous>, transform_indices = @transform_5, window_bounds = array<i64: 8, 8>}, {pipeline_mode = #tpu.pipeline_mode<synchronous>, transform_indices = @transform_6, window_bounds = array<i64: 8, 1>}, {pipeline_mode = #tpu.pipeline_mode<synchronous>, transform_indices = @transform_7, window_bounds = array<i64: 16, 8>}, {pipeline_mode = #tpu.pipeline_mode<synchronous>, transform_indices = @transform_8, window_bounds = array<i64: 16, 1>}, {transform_indices = @transform_9, window_bounds = array<i64: 2, 16, 256>}]} {
    %c0 = arith.constant 0 : index
    %c0_0 = arith.constant 0 : index
    %c0_1 = arith.constant 0 : index
    %0 = vector.load %arg1[%c0, %c0_0, %c0_1] : memref<2x16x256xf32, #tpu.memory_space<vmem>>, vector<1x16x256xf32>
    %1 = vector.shape_cast %0 : vector<1x16x256xf32> to vector<16x256xf32>
    %2 = arith.truncf %1 : vector<16x256xf32> to vector<16x256xbf16>
    %c0_2 = arith.constant 0 : index
    %c0_3 = arith.constant 0 : index
    %3 = vector.load %arg2[%c0_2, %c0_3] : memref<12x16xbf16, #tpu.memory_space<vmem>>, vector<12x16xbf16>
    %cst = arith.constant dense<0.000000e+00> : vector<12x256xf32>
    %4 = tpu.matmul %3, %2, %cst {dimension_numbers = #tpu.dot_dimension_numbers<[1], [0], [0], [1], [0, 0, 1, 1], [], []>} : vector<12x16xbf16>, vector<16x256xbf16>, vector<12x256xf32> -> vector<12x256xf32>
    %c0_4 = arith.constant 0 : index
    %c0_5 = arith.constant 0 : index
    %5 = vector.load %arg3[%c0_4, %c0_5] : memref<12x1xf32, #tpu.memory_space<vmem>>, vector<12x1xf32>
    %6 = vector.broadcast %5 : vector<12x1xf32> to vector<12x256xf32>
    %7 = arith.addf %4, %6 : vector<12x256xf32>
    %cst_6 = arith.constant 0.000000e+00 : f32
    %8 = vector.broadcast %cst_6 : f32 to vector<12x256xf32>
    %9 = arith.maximumf %7, %8 : vector<12x256xf32>
    %10 = vector.extract_strided_slice %9 {offsets = [0, 0], sizes = [8, 256], strides = [1, 1]} : vector<12x256xf32> to vector<8x256xf32>
    %11 = arith.truncf %10 : vector<8x256xf32> to vector<8x256xbf16>
    %12 = vector.extract_strided_slice %9 {offsets = [8, 0], sizes = [4, 256], strides = [1, 1]} : vector<12x256xf32> to vector<4x256xf32>
    %13 = arith.truncf %12 : vector<4x256xf32> to vector<4x256xbf16>
    %cst_7 = arith.constant dense<0.000000e+00> : vector<8x4xf32>
    %14 = tpu.matmul %11, %13, %cst_7 {dimension_numbers = #tpu.dot_dimension_numbers<[1], [1], [0], [0], [0, 0, 1, 0], [], []>} : vector<8x256xbf16>, vector<4x256xbf16>, vector<8x4xf32> -> vector<8x4xf32>
    %c0_8 = arith.constant 0 : index
    %c0_9 = arith.constant 0 : index
    %15 = vector.load %arg4[%c0_8, %c0_9] : memref<4x4xf32, #tpu.memory_space<vmem>>, vector<4x4xf32>
    %cst_10 = arith.constant dense<0.000000e+00> : vector<8x4xf32>
    %16 = tpu.matmul %14, %15, %cst_10 {dimension_numbers = #tpu.dot_dimension_numbers<[1], [1], [0], [0], [0, 0, 1, 0], [], []>} : vector<8x4xf32>, vector<4x4xf32>, vector<8x4xf32> -> vector<8x4xf32>
    %c0_11 = arith.constant 0 : index
    %c0_12 = arith.constant 0 : index
    %17 = vector.load %arg5[%c0_11, %c0_12] : memref<1x4xf32, #tpu.memory_space<vmem>>, vector<1x4xf32>
    %18 = vector.broadcast %17 : vector<1x4xf32> to vector<8x4xf32>
    %19 = arith.addf %16, %18 : vector<8x4xf32>
    %cst_13 = arith.constant 0.000000e+00 : f32
    %20 = vector.broadcast %cst_13 : f32 to vector<8x4xf32>
    %21 = arith.maximumf %19, %20 : vector<8x4xf32>
    %22 = arith.addf %21, %14 : vector<8x4xf32>
    %c0_14 = arith.constant 0 : index
    %c0_15 = arith.constant 0 : index
    %23 = vector.load %arg6[%c0_14, %c0_15] : memref<8x8xf32, #tpu.memory_space<vmem>>, vector<8x8xf32>
    %cst_16 = arith.constant dense<0.000000e+00> : vector<8x4xf32>
    %24 = tpu.matmul %23, %22, %cst_16 {dimension_numbers = #tpu.dot_dimension_numbers<[1], [0], [0], [1], [0, 0, 1, 1], [], []>} : vector<8x8xf32>, vector<8x4xf32>, vector<8x4xf32> -> vector<8x4xf32>
    %c0_17 = arith.constant 0 : index
    %c0_18 = arith.constant 0 : index
    %25 = vector.load %arg7[%c0_17, %c0_18] : memref<8x1xf32, #tpu.memory_space<vmem>>, vector<8x1xf32>
    %26 = vector.broadcast %25 : vector<8x1xf32> to vector<8x4xf32>
    %27 = arith.addf %24, %26 : vector<8x4xf32>
    %cst_19 = arith.constant 0.000000e+00 : f32
    %28 = vector.broadcast %cst_19 : f32 to vector<8x4xf32>
    %29 = arith.maximumf %27, %28 : vector<8x4xf32>
    %c0_20 = arith.constant 0 : index
    %c0_21 = arith.constant 0 : index
    %30 = vector.load %arg8[%c0_20, %c0_21] : memref<16x8xf32, #tpu.memory_space<vmem>>, vector<16x8xf32>
    %cst_22 = arith.constant dense<0.000000e+00> : vector<16x4xf32>
    %31 = tpu.matmul %30, %29, %cst_22 {dimension_numbers = #tpu.dot_dimension_numbers<[1], [0], [0], [1], [0, 0, 1, 1], [], []>} : vector<16x8xf32>, vector<8x4xf32>, vector<16x4xf32> -> vector<16x4xf32>
    %32 = arith.truncf %31 : vector<16x4xf32> to vector<16x4xbf16>
    %cst_23 = arith.constant dense<0.000000e+00> : vector<16x256xf32>
    %33 = tpu.matmul %32, %13, %cst_23 {dimension_numbers = #tpu.dot_dimension_numbers<[1], [0], [0], [1], [0, 0, 1, 1], [], []>} : vector<16x4xbf16>, vector<4x256xbf16>, vector<16x256xf32> -> vector<16x256xf32>
    %c0_24 = arith.constant 0 : index
    %c0_25 = arith.constant 0 : index
    %34 = vector.load %arg9[%c0_24, %c0_25] : memref<16x1xf32, #tpu.memory_space<vmem>>, vector<16x1xf32>
    %35 = vector.broadcast %34 : vector<16x1xf32> to vector<16x256xf32>
    %36 = arith.addf %33, %35 : vector<16x256xf32>
    %cst_26 = arith.constant 0.000000e+00 : f32
    %37 = vector.broadcast %cst_26 : f32 to vector<16x256xf32>
    %38 = arith.maximumf %36, %37 : vector<16x256xf32>
    %39 = arith.addf %1, %38 : vector<16x256xf32>
    %c0_27 = arith.constant 0 : index
    %c0_28 = arith.constant 0 : index
    %c0_29 = arith.constant 0 : index
    %40 = vector.load %arg10[%c0_27, %c0_28, %c0_29] : memref<2x16x256xf32, #tpu.memory_space<vmem>>, vector<1x16x256xf32>
    %41 = vector.shape_cast %40 : vector<1x16x256xf32> to vector<16x256xf32>
    %42 = vector.shape_cast %39 : vector<16x256xf32> to vector<1x16x256xf32>
    tpu.vector_store %arg10[%c0_27, %c0_28, %c0_29], %42 {strides = array<i32>} : memref<2x16x256xf32, #tpu.memory_space<vmem>>, vector<1x16x256xf32>,
    %c1 = arith.constant 1 : index
    %c0_30 = arith.constant 0 : index
    %c0_31 = arith.constant 0 : index
    %43 = vector.load %arg1[%c1, %c0_30, %c0_31] : memref<2x16x256xf32, #tpu.memory_space<vmem>>, vector<1x16x256xf32>
    %44 = vector.shape_cast %43 : vector<1x16x256xf32> to vector<16x256xf32>
    %45 = arith.truncf %44 : vector<16x256xf32> to vector<16x256xbf16>
    %c0_32 = arith.constant 0 : index
    %c0_33 = arith.constant 0 : index
    %46 = vector.load %arg2[%c0_32, %c0_33] : memref<12x16xbf16, #tpu.memory_space<vmem>>, vector<12x16xbf16>
    %cst_34 = arith.constant dense<0.000000e+00> : vector<12x256xf32>
    %47 = tpu.matmul %46, %45, %cst_34 {dimension_numbers = #tpu.dot_dimension_numbers<[1], [0], [0], [1], [0, 0, 1, 1], [], []>} : vector<12x16xbf16>, vector<16x256xbf16>, vector<12x256xf32> -> vector<12x256xf32>
    %c0_35 = arith.constant 0 : index
    %c0_36 = arith.constant 0 : index
    %48 = vector.load %arg3[%c0_35, %c0_36] : memref<12x1xf32, #tpu.memory_space<vmem>>, vector<12x1xf32>
    %49 = vector.broadcast %48 : vector<12x1xf32> to vector<12x256xf32>
    %50 = arith.addf %47, %49 : vector<12x256xf32>
    %cst_37 = arith.constant 0.000000e+00 : f32
    %51 = vector.broadcast %cst_37 : f32 to vector<12x256xf32>
    %52 = arith.maximumf %50, %51 : vector<12x256xf32>
    %53 = vector.extract_strided_slice %52 {offsets = [0, 0], sizes = [8, 256], strides = [1, 1]} : vector<12x256xf32> to vector<8x256xf32>
    %54 = arith.truncf %53 : vector<8x256xf32> to vector<8x256xbf16>
    %55 = vector.extract_strided_slice %52 {offsets = [8, 0], sizes = [4, 256], strides = [1, 1]} : vector<12x256xf32> to vector<4x256xf32>
    %56 = arith.truncf %55 : vector<4x256xf32> to vector<4x256xbf16>
    %cst_38 = arith.constant dense<0.000000e+00> : vector<8x4xf32>
    %57 = tpu.matmul %54, %56, %cst_38 {dimension_numbers = #tpu.dot_dimension_numbers<[1], [1], [0], [0], [0, 0, 1, 0], [], []>} : vector<8x256xbf16>, vector<4x256xbf16>, vector<8x4xf32> -> vector<8x4xf32>
    %c0_39 = arith.constant 0 : index
    %c0_40 = arith.constant 0 : index
    %58 = vector.load %arg4[%c0_39, %c0_40] : memref<4x4xf32, #tpu.memory_space<vmem>>, vector<4x4xf32>
    %cst_41 = arith.constant dense<0.000000e+00> : vector<8x4xf32>
    %59 = tpu.matmul %57, %58, %cst_41 {dimension_numbers = #tpu.dot_dimension_numbers<[1], [1], [0], [0], [0, 0, 1, 0], [], []>} : vector<8x4xf32>, vector<4x4xf32>, vector<8x4xf32> -> vector<8x4xf32>
    %c0_42 = arith.constant 0 : index
    %c0_43 = arith.constant 0 : index
    %60 = vector.load %arg5[%c0_42, %c0_43] : memref<1x4xf32, #tpu.memory_space<vmem>>, vector<1x4xf32>
    %61 = vector.broadcast %60 : vector<1x4xf32> to vector<8x4xf32>
    %62 = arith.addf %59, %61 : vector<8x4xf32>
    %cst_44 = arith.constant 0.000000e+00 : f32
    %63 = vector.broadcast %cst_44 : f32 to vector<8x4xf32>
    %64 = arith.maximumf %62, %63 : vector<8x4xf32>
    %65 = arith.addf %64, %57 : vector<8x4xf32>
    %c0_45 = arith.constant 0 : index
    %c0_46 = arith.constant 0 : index
    %66 = vector.load %arg6[%c0_45, %c0_46] : memref<8x8xf32, #tpu.memory_space<vmem>>, vector<8x8xf32>
    %cst_47 = arith.constant dense<0.000000e+00> : vector<8x4xf32>
    %67 = tpu.matmul %66, %65, %cst_47 {dimension_numbers = #tpu.dot_dimension_numbers<[1], [0], [0], [1], [0, 0, 1, 1], [], []>} : vector<8x8xf32>, vector<8x4xf32>, vector<8x4xf32> -> vector<8x4xf32>
    %c0_48 = arith.constant 0 : index
    %c0_49 = arith.constant 0 : index
    %68 = vector.load %arg7[%c0_48, %c0_49] : memref<8x1xf32, #tpu.memory_space<vmem>>, vector<8x1xf32>
    %69 = vector.broadcast %68 : vector<8x1xf32> to vector<8x4xf32>
    %70 = arith.addf %67, %69 : vector<8x4xf32>
    %cst_50 = arith.constant 0.000000e+00 : f32
    %71 = vector.broadcast %cst_50 : f32 to vector<8x4xf32>
    %72 = arith.maximumf %70, %71 : vector<8x4xf32>
    %c0_51 = arith.constant 0 : index
    %c0_52 = arith.constant 0 : index
    %73 = vector.load %arg8[%c0_51, %c0_52] : memref<16x8xf32, #tpu.memory_space<vmem>>, vector<16x8xf32>
    %cst_53 = arith.constant dense<0.000000e+00> : vector<16x4xf32>
    %74 = tpu.matmul %73, %72, %cst_53 {dimension_numbers = #tpu.dot_dimension_numbers<[1], [0], [0], [1], [0, 0, 1, 1], [], []>} : vector<16x8xf32>, vector<8x4xf32>, vector<16x4xf32> -> vector<16x4xf32>
    %75 = arith.truncf %74 : vector<16x4xf32> to vector<16x4xbf16>
    %cst_54 = arith.constant dense<0.000000e+00> : vector<16x256xf32>
    %76 = tpu.matmul %75, %56, %cst_54 {dimension_numbers = #tpu.dot_dimension_numbers<[1], [0], [0], [1], [0, 0, 1, 1], [], []>} : vector<16x4xbf16>, vector<4x256xbf16>, vector<16x256xf32> -> vector<16x256xf32>
    %c0_55 = arith.constant 0 : index
    %c0_56 = arith.constant 0 : index
    %77 = vector.load %arg9[%c0_55, %c0_56] : memref<16x1xf32, #tpu.memory_space<vmem>>, vector<16x1xf32>
    %78 = vector.broadcast %77 : vector<16x1xf32> to vector<16x256xf32>
    %79 = arith.addf %76, %78 : vector<16x256xf32>
    %cst_57 = arith.constant 0.000000e+00 : f32
    %80 = vector.broadcast %cst_57 : f32 to vector<16x256xf32>
    %81 = arith.maximumf %79, %80 : vector<16x256xf32>
    %82 = arith.addf %44, %81 : vector<16x256xf32>
    %c1_58 = arith.constant 1 : index
    %c0_59 = arith.constant 0 : index
    %c0_60 = arith.constant 0 : index
    %83 = vector.load %arg10[%c1_58, %c0_59, %c0_60] : memref<2x16x256xf32, #tpu.memory_space<vmem>>, vector<1x16x256xf32>
    %84 = vector.shape_cast %83 : vector<1x16x256xf32> to vector<16x256xf32>
    %85 = vector.shape_cast %82 : vector<16x256xf32> to vector<1x16x256xf32>
    tpu.vector_store %arg10[%c1_58, %c0_59, %c0_60], %85 {strides = array<i32>} : memref<2x16x256xf32, #tpu.memory_space<vmem>>, vector<1x16x256xf32>,
    return
  }
  func.func @transform_0(%arg0: i32) -> (i32, i32, i32) {
    %c0_i32 = arith.constant 0 : i32
    %c0_i32_0 = arith.constant 0 : i32
    %c0_i32_1 = arith.constant 0 : i32
    return %arg0, %c0_i32, %c0_i32_0 : i32, i32, i32
  }
  func.func @transform_1(%arg0: i32) -> (i32, i32) {
    %c0_i32 = arith.constant 0 : i32
    %c0_i32_0 = arith.constant 0 : i32
    %c0_i32_1 = arith.constant 0 : i32
    return %c0_i32, %c0_i32_0 : i32, i32
  }
  func.func @transform_2(%arg0: i32) -> (i32, i32) {
    %c0_i32 = arith.constant 0 : i32
    %c0_i32_0 = arith.constant 0 : i32
    %c0_i32_1 = arith.constant 0 : i32
    return %c0_i32, %c0_i32_0 : i32, i32
  }
  func.func @transform_3(%arg0: i32) -> (i32, i32) {
    %c0_i32 = arith.constant 0 : i32
    %c0_i32_0 = arith.constant 0 : i32
    %c0_i32_1 = arith.constant 0 : i32
    return %c0_i32, %c0_i32_0 : i32, i32
  }
  func.func @transform_4(%arg0: i32) -> (i32, i32) {
    %c0_i32 = arith.constant 0 : i32
    %c0_i32_0 = arith.constant 0 : i32
    %c0_i32_1 = arith.constant 0 : i32
    return %c0_i32, %c0_i32_0 : i32, i32
  }
  func.func @transform_5(%arg0: i32) -> (i32, i32) {
    %c0_i32 = arith.constant 0 : i32
    %c0_i32_0 = arith.constant 0 : i32
    %c0_i32_1 = arith.constant 0 : i32
    return %c0_i32, %c0_i32_0 : i32, i32
  }
  func.func @transform_6(%arg0: i32) -> (i32, i32) {
    %c0_i32 = arith.constant 0 : i32
    %c0_i32_0 = arith.constant 0 : i32
    %c0_i32_1 = arith.constant 0 : i32
    return %c0_i32, %c0_i32_0 : i32, i32
  }
  func.func @transform_7(%arg0: i32) -> (i32, i32) {
    %c0_i32 = arith.constant 0 : i32
    %c0_i32_0 = arith.constant 0 : i32
    %c0_i32_1 = arith.constant 0 : i32
    return %c0_i32, %c0_i32_0 : i32, i32
  }
  func.func @transform_8(%arg0: i32) -> (i32, i32) {
    %c0_i32 = arith.constant 0 : i32
    %c0_i32_0 = arith.constant 0 : i32
    %c0_i32_1 = arith.constant 0 : i32
    return %c0_i32, %c0_i32_0 : i32, i32
  }
  func.func @transform_9(%arg0: i32) -> (i32, i32, i32) {
    %c0_i32 = arith.constant 0 : i32
    %c0_i32_0 = arith.constant 0 : i32
    %c0_i32_1 = arith.constant 0 : i32
    return %arg0, %c0_i32, %c0_i32_0 : i32, i32, i32
  }
}

</mosaic_0001>

<bundles_post_ra>
// kernel: tpu_custom_call.1
= control target key start
LH: loop header
LB: loop body
LE: loop exit
PB: predicated region body
PF: predicated region fallthrough
CT: control target
= control target key end

     0   :  { %14 = vsyncpa [#allocation3], 0  ;;  %s1360_s0 = inlined_call_operand.vmem [shape: f32[2,16,256], index: 0, kind: input, shape index: {}]   ;;  %s1361_s1 = inlined_call_operand.hbm [shape: bf16[12,16], index: 1, kind: input, shape index: {}]   ;;  %s1362_s2 = inlined_call_operand.vmem [shape: f32[12,1], index: 2, kind: input, shape index: {}]   ;;  %s1363_s3 = inlined_call_operand.hbm [shape: f32[4,4], index: 3, kind: input, shape index: {}]   ;;  %s1364_s4 = inlined_call_operand.vmem [shape: f32[1,4], index: 4, kind: input, shape index: {}]   ;;  %s1365_s5 = inlined_call_operand.vmem [shape: f32[8,8], index: 5, kind: input, shape index: {}]   ;;  %s1366_s6 = inlined_call_operand.vmem [shape: f32[8,1], index: 6, kind: input, shape index: {}]   ;;  %s1367_s7 = inlined_call_operand.vmem [shape: f32[16,8], index: 7, kind: input, shape index: {}]   ;;  %s1368_s8 = inlined_call_operand.vmem [shape: f32[16,1], index: 8, kind: input, shape index: {}]   ;;  %s1369_s9 = inlined_call_operand.hbm [shape: f32[2,16,256], index: 9, kind: output, shape index: {}]  }
   0x1   :  { %15 = vsyncpa [#allocation6], 0 }
   0x2   :  { %16 = vsyncpa [#allocation4], 0  ;;  %s1130_s30 = smov [#allocation2]   ;;  %s1058_s13 = scalar_lea.hbm %s1361_s1, 128 }
   0x3   :  { %s24_s10 = sshll.u32 %s1130_s30, 4  ;;  %p1059_p0 = scmp.ne.s32.totalorder %s1361_s1, %s1058_s13  ;;  %s25_s10 = int_to_ptr.vmem [resolvable:$true] %s24_s10 }
   0x4   :  { %p1062_p1 = scmp.lt.u32.totalorder %s1058_s13, %s1361_s1 }
   0x6   :  { %p1064_p2 = pnand %p1062_p1, %p1059_p0 }
   0x8   :  { %1067 = shalt.err (!%p1064_p2)
}
   0x9   :  { %s1068_s18 = scalar_lea.vmem %s25_s10, 128  ;;  %p1073_p4 = scmp.lt.s32.totalorder %s25_s10, %s25_s10 }
   0xa   :  { %p1069_p3 = scmp.ne.s32.totalorder %s25_s10, %s1068_s18  ;;  %p1074_p5 = scmp.lt.s32.totalorder %s1068_s18, %s1068_s18 }
   0xc   :  { %p1075_p6 = por %p1074_p5, %p1073_p4 }
   0xe   :  { %p1076_p7 = pnand %p1075_p6, %p1069_p3 }
  0x10   :  { %1079 = shalt.err (!%p1076_p7)
}
  0x11   :  { %s1131_s19 = smov 64   ;;  %s1132_s20 = smov 4  }
  0x12   :  { %30 = dma.hbm_to_vmem [thread:$0]  %s1361_s1, 128, %s25_s10, [#allocation3], %s1131_s19, %s1131_s19, %s1132_s20  }
  0x13   :  { %s1133_s23 = smov [#allocation5]   ;;  %s1080_s27 = scalar_lea.hbm %s1363_s3, 64 }
  0x14   :  { %s39_s24 = sshll.u32 %s1133_s23, 4  ;;  %p1081_p8 = scmp.ne.s32.totalorder %s1363_s3, %s1080_s27  ;;  %s40_s24 = int_to_ptr.vmem [resolvable:$true] %s39_s24 }
  0x15   :  { %p1084_p9 = scmp.lt.u32.totalorder %s1080_s27, %s1363_s3 }
  0x17   :  { %p1086_p10 = pnand %p1084_p9, %p1081_p8 }
  0x19   :  { %1089 = shalt.err (!%p1086_p10)
}
  0x1a   :  { %s1090_s12 = scalar_lea.vmem %s40_s24, 64  ;;  %p1095_p12 = scmp.lt.s32.totalorder %s40_s24, %s40_s24 }
  0x1b   :  { %p1091_p11 = scmp.ne.s32.totalorder %s40_s24, %s1090_s12  ;;  %p1096_p13 = scmp.lt.s32.totalorder %s1090_s12, %s1090_s12 }
  0x1d   :  { %p1097_p0 = por %p1096_p13, %p1095_p12 }
  0x1f   :  { %p1098_p1 = pnand %p1097_p0, %p1091_p11 }
  0x21   :  { %1101 = shalt.err (!%p1098_p1)
}
  0x22   :  { %42 = dma.hbm_to_vmem [thread:$0]  %s1363_s3, 64, %s40_s24, [#allocation6]  }
  0x23   :  { %1124 = dma.done.wait [#allocation3], 128  }
  0x24   :  { %1125 = vsyncadd [#allocation3], 4294967168 }
  0x25   :  { %1126 = dma.done.wait [#allocation6], 64  }
  0x26   :  { %1127 = vsyncadd [#allocation6], 4294967232  ;;  %v1134_v0 = vmov 0   ;;  %v1220_v1 = vld [vmem:[%s1360_s0 + $0x8] sm:$0xff]  ;;  %v1225_v2 = vld [vmem:[%s1360_s0 + $0x18] sm:$0xff]  ;;  %vm85_vm0 = vcmask 130048  }
  0x27   :  { %121 = vmatprep.mubr.bf16.mxu0 %v1134_v0  ;;  %1054 = vset.pattern.permute.xlu0 %v1134_v0  ;;  %v1230_v3 = vld [vmem:[%s1360_s0] sm:$0xff]  ;;  %v65_v4 = vpack.c.bf16 %v1225_v2, %v1220_v1  ;;  %v1237_v5 = vld [vmem:[%s1360_s0 + $0x10] sm:$0xff]  ;;  %v69_v7 = vld [vmem:[%s1362_s2 + $0x8] sm:$0xf]  ;;  %vm188_vm1 = vcmask 31744   ;;  %v1135_v12 = vmov 0.0  }
  0x28   :  { %1055 = vset.pattern.permute.xlu1 %v1134_v0  ;;  %v64_v6 = vpack.c.bf16 %v1237_v5, %v1230_v3  ;;  %v1056_v8 = vld [vmem:[#allocation2] sm:$0x3f]   ;;  %77 = vperm.xlu0 %1054, %v69_v7   ;;  %v180_v11 = vld [vmem:[#allocation5] sm:$0xf]  ;;  %vm1136_vm2 = vmmov 0   ;;  %vm274_vm3 = vcmask 64512  }
  0x29   :  { %89 = vmatprep.subr.bf16.mxu0 %v65_v4  ;;  %v68_v9 = vld [vmem:[%s1362_s2] sm:$0xff]  ;;  %v520_v36 = vld [vmem:[%s1362_s2 + $0x8] sm:$0xf]  ;;  %vm448_vm4 = vcmask 1041408   ;;  %v1296_v50 = vld [vmem:[%s1360_s0 + $0x38] sm:$0xff] }
  0x2a   :  { %90 = vmatpush1.bf16.msra.mxu0 %v64_v6  ;;  %v433_v10 = vld [vmem:[%s1368_s8] sm:$0xff]  ;;  %v434_v37 = vld [vmem:[%s1368_s8 + $0x8] sm:$0xff]  ;;  %v1306_v54 = vld [vmem:[%s1360_s0 + $0x30] sm:$0xff] }
  0x2b   :  { %1014 = vmatprep.subr.mxu0 %v1135_v12  ;;  %v268_v35 = vld [vmem:[%s1366_s6] sm:$0xff]  ;;  %v1291_v49 = vld [vmem:[%s1360_s0 + $0x28] sm:$0xff] }
  0x2c   :  { %72 = vperm.xlu0 %1054, %v68_v9   ;;  %271 = vperm.xlu1 %1055, %v268_v35   ;;  %v1271_v38 = vld [vmem:[%s1364_s4] ss:$0 sm:$0xff]  ;;  %v516_v56 = vpack.c.bf16 %v1296_v50, %v1291_v49  ;;  %v1313_v57 = vld [vmem:[%s1367_s7 + $0x8] sm:$0xff] }
  0x2d   :  { %977 = vmatmul.mubr.msk.bf16.vlgmr.msra.gmra.mrb[0].mxu0 %vm85_vm0, %v1056_v8  ;;  %v1277_v44 = vld [vmem:[%s1365_s5] sm:$0xff] }
  0x2e   :  { %1016 = vmatprep.mubr.msk.f32.mxu0 %vm1136_vm2, %v1135_v12  ;;  %v349_v46 = vld [vmem:[%s1367_s7] sm:$0xff] }
  0x2f   :  { %v1301_v53 = vld [vmem:[%s1360_s0 + $0x20] sm:$0xff]  ;;  %s1137_s0 = smov [#allocation7]  }
  0x30   :  { %523 = vperm.xlu0 %1054, %v68_v9   ;;  %528 = vperm.xlu1 %1055, %v520_v36   ;;  %v515_v58 = vpack.c.bf16 %v1306_v54, %v1301_v53  ;;  %v1057_v59 = vld [vmem:[#allocation2] sm:$0x3f]   ;;  %s963_s7 = sshll.u32 %s1137_s0, 4  ;;  %s964_s7 = int_to_ptr.vmem [resolvable:$true] %s963_s7 }
  0x31   :  { %s1102_s20 = scalar_lea.vmem %s964_s7, 1024  ;;  %p1107_p3 = scmp.lt.s32.totalorder %s964_s7, %s964_s7 }
  0x32   :  { %p1103_p2 = scmp.ne.s32.totalorder %s964_s7, %s1102_s20  ;;  %p1108_p4 = scmp.lt.s32.totalorder %s1102_s20, %s1102_s20 }
  0x33   :  { %1015 = vmatpush3.xpose.msk.msra.mxu0 %vm188_vm1, %v180_v11 }
  0x34   :  { %437 = vperm.xlu0 %1054, %v433_v10   ;;  %1019 = vmatprep.subr.mxu0 %v1135_v12  ;;  %p1109_p5 = por %p1108_p4, %p1107_p3 }
  0x35   :  { %720 = vperm.xlu1 %1055, %v268_v35  }
  0x36   :  { %p1110_p6 = pnand %p1109_p5, %p1103_p2 }
  0x38   :  { %885 = vperm.xlu0 %1054, %v433_v10  }
  0x39   :  { %442 = vperm.xlu1 %1055, %v434_v37  }
  0x3d   :  { %890 = vperm.xlu1 %1055, %v434_v37  }
  0xa7   :  { %v78_v13 = vpop.permute.xlu0 %77 }
  0xab   :  { %v73_v15 = vpop.permute.xlu0 %72  ;;  %v272_v47 = vpop.permute.xlu1 %271 }
  0xaf   :  { %v524_v4 = vpop.permute.xlu0 %523  ;;  %v529_v7 = vpop.permute.xlu1 %528 }
 0x100   :  { %v123_v14 = vpop.f32.mrb[0].mxu0 }
 0x101   :  { %v125_v16 = vpop.f32.mrb[1].mxu0  ;;  %v124_v26 = vadd.f32 %v123_v14, %v73_v15 }
 0x102   :  { %v126_v17 = vadd.f32 %v125_v16, %v73_v15  ;;  %v127_v18 = vpop.f32.mrb[2].mxu0 }
 0x103   :  { %v128_v19 = vadd.f32 %v127_v18, %v78_v13  ;;  %v129_v20 = vpop.f32.mrb[3].mxu0  ;;  %v132_v29 = vmax.f32 %v124_v26, 0.0 }
 0x104   :  { %v130_v21 = vadd.f32 %v129_v20, %v78_v13  ;;  %v133_v22 = vmax.f32 %v126_v17, 0.0 }
 0x105   :  { %v134_v23 = vmax.f32 %v128_v19, 0.0  ;;  %v136_v30 = vpack.c.bf16 %v132_v29, %v132_v29 }
 0x106   :  { %v135_v24 = vmax.f32 %v130_v21, 0.0  ;;  %v137_v25 = vpack.c.bf16 %v133_v22, %v133_v22 }
 0x107   :  { %v138_v28 = vpack.c.bf16 %v134_v23, %v134_v23  ;;  %v630_v23 = vld [vmem:[#allocation5] sm:$0xf] }
 0x108   :  { %172 = vmatprep.mubr.bf16.mxu1 %v137_v25  ;;  %v139_v27 = vpack.c.bf16 %v135_v24, %v135_v24  ;;  %v721_v24 = vpop.permute.xlu1 %720  ;;  %v438_v25 = vpop.permute.xlu0 %437 }
 0x109   :  { %v450_v45 = vsel %vm448_vm4, %v138_v28, 0 }
 0x10a   :  { %140 = vmatprep.subr.bf16.mxu1 %v139_v27 }
 0x10b   :  { %141 = vmatpush1.bf16.xpose.msra.mxu1 %v138_v28 }
 0x10c   :  { %v443_v29 = vpop.permute.xlu1 %442 }
 0x112   :  { %173 = vmatmul.mubr.bf16.vlgmr.msra.gmra.mrb[0].mxu1 %v136_v30 }
 0x113   :  { %1026 = vmatprep.mubr.msk.f32.mxu1 %vm274_vm3, %v349_v46 }
 0x1e5   :  { %v174_v31 = vpop.f32.mrb[0].mxu1 }
 0x1e6   :  { %v176_v32 = vpop.f32.mrb[1].mxu1  ;;  %1017 = vmatmul.mubr.msk.f32.vlgmr.msra.gmra.mrb[4].mxu0 %vm188_vm1, %v174_v31 }
 0x1e7   :  { %v177_v33 = vpop.f32.mrb[2].mxu1  ;;  %1021 = vmatprep.mubr.msk.f32.mxu0 %vm1136_vm2, %v1135_v12 }
 0x1e8   :  { %v178_v34 = vpop.f32.mrb[3].mxu1 }
 0x2b9   :  { %v261_v39 = vpop.f32.mrb[4].mxu0 }
 0x2ba   :  { %v262_v40 = vadd.f32 %v1271_v38, %v261_v39  ;;  %v1018_v41 = vpop.f32.mrb[5].mxu0 }
 0x2bc   :  { %v265_v42 = vmax.f32 %v262_v40, 0.0 }
 0x2be   :  { %v266_v43 = vadd.f32 %v265_v42, %v174_v31 }
 0x2c0   :  { %1020 = vmatpush3.msra.mxu0 %v266_v43 }
 0x2c1   :  { %1022 = vmatmul.mubr.msk.f32.vlgmr.msra.gmra.mrb[6].mxu0 %vm274_vm3, %v1277_v44  ;;  %984 = vmatprep.subr.msk.bf16.mxu0 %vm448_vm4, %v139_v27 }
 0x2c2   :  { %456 = vmatpush1.bf16.msra.mxu0 %v450_v45  ;;  %487 = vmatprep.mubr.bf16.mxu0 %v1134_v0 }
 0x394   :  { %v344_v48 = vpop.f32.mrb[6].mxu0 }
 0x395   :  { %v345_v51 = vadd.f32 %v344_v48, %v272_v47  ;;  %v1023_v52 = vpop.f32.mrb[7].mxu0 }
 0x397   :  { %v348_v55 = vmax.f32 %v345_v51, 0.0 }
 0x399   :  { %1024 = vmatprep.subr.mxu1 %v348_v55 }
 0x39a   :  { %1025 = vmatpush3.msra.mxu1 %v348_v55 }
 0x39b   :  { %1027 = vmatmul.mubr.msk.f32.vlgmr.msra.gmra.mrb[4].mxu1 %vm274_vm3, %v1313_v57  ;;  %539 = vmatprep.subr.bf16.mxu1 %v516_v56 }
 0x39c   :  { %540 = vmatpush1.bf16.msra.mxu1 %v515_v58  ;;  %571 = vmatprep.mubr.bf16.mxu1 %v1134_v0 }
 0x39d   :  { %1029 = vmatprep.subr.mxu1 %v1135_v12 }
 0x39f   :  { %991 = vmatmul.mubr.msk.bf16.vlgmr.msra.gmra.mrb[8].mxu1 %vm85_vm0, %v1057_v59 }
 0x3a0   :  { %1031 = vmatprep.mubr.msk.f32.mxu1 %vm1136_vm2, %v1135_v12 }
 0x3a5   :  { %1030 = vmatpush3.xpose.msk.msra.mxu1 %vm188_vm1, %v630_v23 }
 0x3a6   :  { %1034 = vmatprep.subr.mxu1 %v1135_v12 }
 0x46e   :  { %v1028_v60 = vpop.f32.mrb[4].mxu1 }
 0x46f   :  { %v423_v61 = vpop.f32.mrb[5].mxu1 }
 0x470   :  { %v432_v62 = vpack.c.bf16 %v1028_v60, %v423_v61 }
 0x472   :  { %985 = vmatmul.mubr.msk.bf16.vlgmr.msra.gmra.mrb[8].mxu0 %vm188_vm1, %v432_v62  ;;  %v573_v63 = vpop.f32.mrb[8].mxu1 }
 0x473   :  { %v575_v6 = vpop.f32.mrb[9].mxu1  ;;  %v574_v18 = vadd.f32 %v573_v63, %v524_v4 }
 0x474   :  { %v576_v8 = vadd.f32 %v575_v6, %v524_v4  ;;  %v577_v9 = vpop.f32.mrb[10].mxu1  ;;  %v891_v4 = vpop.permute.xlu1 %890 }
 0x475   :  { %v578_v10 = vadd.f32 %v577_v9, %v529_v7  ;;  %v579_v11 = vpop.f32.mrb[11].mxu1  ;;  %v582_v21 = vmax.f32 %v574_v18, 0.0 }
 0x476   :  { %v583_v13 = vmax.f32 %v576_v8, 0.0  ;;  %v580_v14 = vadd.f32 %v579_v11, %v529_v7 }
 0x477   :  { %v584_v15 = vmax.f32 %v578_v10, 0.0  ;;  %v586_v22 = vpack.c.bf16 %v582_v21, %v582_v21 }
 0x478   :  { %v587_v16 = vpack.c.bf16 %v583_v13, %v583_v13  ;;  %v585_v17 = vmax.f32 %v580_v14, 0.0 }
 0x479   :  { %v588_v20 = vpack.c.bf16 %v584_v15, %v584_v15 }
 0x47a   :  { %v589_v19 = vpack.c.bf16 %v585_v17, %v585_v17  ;;  %622 = vmatprep.mubr.bf16.mxu0 %v587_v16 }
 0x47c   :  { %590 = vmatprep.subr.bf16.mxu0 %v589_v19 }
 0x47d   :  { %591 = vmatpush1.bf16.xpose.msra.mxu0 %v588_v20 }
 0x484   :  { %623 = vmatmul.mubr.bf16.vlgmr.msra.gmra.mrb[12].mxu0 %v586_v22 }
 0x485   :  { %1041 = vmatprep.mubr.msk.f32.mxu0 %vm274_vm3, %v349_v46 }
 0x545   :  { %v489_v26 = vpop.f32.mrb[8].mxu0 }
 0x546   :  { %v490_v27 = vadd.f32 %v489_v26, %v438_v25  ;;  %v491_v28 = vpop.f32.mrb[9].mxu0 }
 0x547   :  { %v492_v30 = vadd.f32 %v491_v28, %v438_v25  ;;  %v493_v31 = vpop.f32.mrb[10].mxu0 }
 0x548   :  { %v498_v32 = vmax.f32 %v490_v27, 0.0  ;;  %v494_v33 = vadd.f32 %v493_v31, %v443_v29  ;;  %v495_v34 = vpop.f32.mrb[11].mxu0 }
 0x549   :  { %v499_v35 = vmax.f32 %v492_v30, 0.0  ;;  %v496_v36 = vadd.f32 %v495_v34, %v443_v29 }
 0x54a   :  { %v502_v37 = vadd.f32 %v498_v32, %v1230_v3  ;;  %v500_v39 = vmax.f32 %v494_v33, 0.0 }
 0x54b   :  { %v503_v40 = vadd.f32 %v499_v35, %v1220_v1  ;;  %v501_v41 = vmax.f32 %v496_v36, 0.0 }
 0x54c   :  { %506 = vst [vmem:[#allocation7] sm:$0xff] %v502_v37  ;;  %v504_v42 = vadd.f32 %v500_v39, %v1237_v5 }
 0x54d   :  { %507 = vst [vmem:[#allocation7 + $0x8] sm:$0xff] %v503_v40  ;;  %v505_v43 = vadd.f32 %v501_v41, %v1225_v2  ;;  %v897_v2 = vsel %vm448_vm4, %v588_v20, 0 }
 0x54e   :  { %508 = vst [vmem:[#allocation7 + $0x10] sm:$0xff] %v504_v42 }
 0x54f   :  { %509 = vst [vmem:[#allocation7 + $0x18] sm:$0xff] %v505_v43 }
 0x557   :  { %v624_v45 = vpop.f32.mrb[12].mxu0 }
 0x558   :  { %v626_v46 = vpop.f32.mrb[13].mxu0  ;;  %1032 = vmatmul.mubr.msk.f32.vlgmr.msra.gmra.mrb[6].mxu1 %vm188_vm1, %v624_v45 }
 0x559   :  { %v627_v47 = vpop.f32.mrb[14].mxu0  ;;  %1036 = vmatprep.mubr.msk.f32.mxu1 %vm1136_vm2, %v1135_v12 }
 0x55a   :  { %v628_v3 = vpop.f32.mrb[15].mxu0 }
 0x62b   :  { %v710_v48 = vpop.f32.mrb[6].mxu1 }
 0x62c   :  { %v711_v1 = vadd.f32 %v1271_v38, %v710_v48  ;;  %v1033_v51 = vpop.f32.mrb[7].mxu1 }
 0x62e   :  { %v714_v52 = vmax.f32 %v711_v1, 0.0 }
 0x630   :  { %v715_v5 = vadd.f32 %v714_v52, %v624_v45 }
 0x632   :  { %1035 = vmatpush3.msra.mxu1 %v715_v5 }
 0x633   :  { %1037 = vmatmul.mubr.msk.f32.vlgmr.msra.gmra.mrb[12].mxu1 %vm274_vm3, %v1277_v44  ;;  %998 = vmatprep.subr.msk.bf16.mxu1 %vm448_vm4, %v589_v19  ;;  %v886_v44 = vpop.permute.xlu0 %885 }
 0x634   :  { %903 = vmatpush1.bf16.msra.mxu1 %v897_v2  ;;  %934 = vmatprep.mubr.bf16.mxu1 %v1134_v0 }
 0x706   :  { %v792_v55 = vpop.f32.mrb[12].mxu1 }
 0x707   :  { %v793_v12 = vadd.f32 %v792_v55, %v721_v24  ;;  %v1038_v56 = vpop.f32.mrb[13].mxu1 }
 0x709   :  { %v796_v58 = vmax.f32 %v793_v12, 0.0 }
 0x70b   :  { %1039 = vmatprep.subr.mxu0 %v796_v58 }
 0x70c   :  { %1040 = vmatpush3.msra.mxu0 %v796_v58 }
 0x70d   :  { %1042 = vmatmul.mubr.msk.f32.vlgmr.msra.gmra.mrb[16].mxu0 %vm274_vm3, %v1313_v57 }
 0x7e0   :  { %v1043_v38 = vpop.f32.mrb[16].mxu0 }
 0x7e1   :  { %v871_v59 = vpop.f32.mrb[17].mxu0 }
 0x7e2   :  { %v880_v60 = vpack.c.bf16 %v1043_v38, %v871_v59 }
 0x7e4   :  { %999 = vmatmul.mubr.msk.bf16.vlgmr.msra.gmra.mrb[16].mxu1 %vm188_vm1, %v880_v60 }
 0x8b7   :  { %v936_v61 = vpop.f32.mrb[16].mxu1 }
 0x8b8   :  { %v937_v62 = vadd.f32 %v936_v61, %v886_v44  ;;  %v938_v63 = vpop.f32.mrb[17].mxu1 }
 0x8b9   :  { %v939_v0 = vadd.f32 %v938_v63, %v886_v44  ;;  %v940_v6 = vpop.f32.mrb[18].mxu1 }
 0x8ba   :  { %v945_v7 = vmax.f32 %v937_v62, 0.0  ;;  %v941_v8 = vadd.f32 %v940_v6, %v891_v4  ;;  %v942_v9 = vpop.f32.mrb[19].mxu1 }
 0x8bb   :  { %v946_v10 = vmax.f32 %v939_v0, 0.0  ;;  %v943_v11 = vadd.f32 %v942_v9, %v891_v4 }
 0x8bc   :  { %v949_v57 = vadd.f32 %v1301_v53, %v945_v7  ;;  %v947_v13 = vmax.f32 %v941_v8, 0.0 }
 0x8bd   :  { %v950_v14 = vadd.f32 %v1291_v49, %v946_v10  ;;  %v948_v15 = vmax.f32 %v943_v11, 0.0 }
 0x8be   :  { %954 = vst [vmem:[#allocation7 + $0x20] sm:$0xff] %v949_v57  ;;  %v951_v16 = vadd.f32 %v1306_v54, %v947_v13 }
 0x8bf   :  { %955 = vst [vmem:[#allocation7 + $0x28] sm:$0xff] %v950_v14  ;;  %v952_v17 = vadd.f32 %v1296_v50, %v948_v15 }
 0x8c0   :  { %956 = vst [vmem:[#allocation7 + $0x30] sm:$0xff] %v951_v16 }
 0x8c1   :  { %957 = vst [vmem:[#allocation7 + $0x38] sm:$0xff] %v952_v17 }
 0x8c2   :  { %1113 = shalt.err (!%p1110_p6)
}
 0x8c3   :  { %s1114_s23 = scalar_lea.hbm %s1369_s9, 1024 }
 0x8c4   :  { %p1115_p7 = scmp.ne.s32.totalorder %s1369_s9, %s1114_s23  ;;  %p1118_p8 = scmp.lt.u32.totalorder %s1114_s23, %s1369_s9 }
 0x8c6   :  { %p1120_p9 = pnand %p1118_p8, %p1115_p7 }
 0x8c8   :  { %1123 = shalt.err (!%p1120_p9)
}
 0x8c9   :  { %s1138_s28 = smov 256   ;;  %s1139_s29 = smov 16  }
 0x8ca   :  { %969 = dma.vmem_to_hbm [thread:$0]  %s964_s7, 1024, %s1369_s9, [#allocation4], %s1138_s28, %s1138_s28, %s1139_s29  }
 0x8cb   :  { %1128 = dma.done.wait [#allocation4], 1024  }
 0x8cc   :  { %1129 = vsyncadd [#allocation4], 4294966272 }
 0x8cd   :  { %973 = vsyncpa [#allocation3], 1 }
 0x8ce   :  { %974 = vsyncpa [#allocation6], 1 }
 0x8cf   :  { %975 = vsyncpa [#allocation4], 1 }

</bundles_post_ra>
